<compile_context>
chip_gen: v6e
topology: v6e:2x2x1
jax: 0.10.0
libtpu: 0.0.40
codegen_flags: <defaults>
</compile_context>

<pallas_src>
import functools
import math

import jax
import jax.numpy as jnp
from jax.experimental import pallas as pl
from jax.experimental.pallas import tpu as pltpu


_LANES = 128
_MAX_ROW_TILE = 8192          # rows per grid step; f32 (8192, 128) tile = 4 MiB
_HALF_PI = math.pi / 2.0


def _round_up(n: int, m: int) -> int:
    return ((n + m - 1) // m) * m


def _row_tile(n: int) -> int:
    """Rows per grid step.

    Small n: one full block (block shape == array shape, no (8,128) issue).
    Larger n: >= 2 grid steps so ("parallel",) dimension semantics can shard
    across v7x's two TensorCores; tiles stay 8-aligned and are capped so the
    double-buffered output tile stays comfortably inside VMEM on all gens.
    """
    if n <= 64:
        return n
    return min(_round_up(pl.cdiv(n, 2), 8), _MAX_ROW_TILE)


def _freq_table(dim: int) -> jax.Array:
    half = dim // 2
    scale = math.log(10000.0) / (half - 1)
    return jnp.exp(jnp.arange(half, dtype=jnp.float32) * (-scale))  # (half,)


# ---------------------------------------------------------------------------
# Packed (lane-dense) kernel: pack = 128 // dim batch rows per 128-lane row.
# ---------------------------------------------------------------------------
def _packed_kernel(x_ref, w_ref, out_ref, *, pack: int):
    # x_ref:   (pack, TR, 1) f32  -- timestep of packed slot p, packed row r
    # w_ref:   (pack+1, 128) f32  -- rows 0..pack-1: per-slot masked freqs;
    #                                row pack: additive offset (0 | pi/2)
    # out_ref: (TR, 128)          -- [sin|cos] for `pack` batch rows per row
    #
    # phase[r, l] = x[r*pack + l//dim] * pattern[l] + offset[l], built as a
    # sum of per-slot VPU broadcast multiplies (other slots contribute 0).
    phase = x_ref[0] * w_ref[0:1, :] + w_ref[pack:pack + 1, :]
    for p in range(1, pack):
        phase = phase + x_ref[p] * w_ref[p:p + 1, :]
    out_ref[...] = jnp.sin(phase).astype(out_ref.dtype)   # single EUP/VALU pass


# ---------------------------------------------------------------------------
# Fallback row-wise kernel (dim does not pack evenly into 128 lanes).
# ---------------------------------------------------------------------------
def _rowwise_kernel(x_ref, t_ref, out_ref):
    # x_ref: (TB, 1), t_ref: (2, dim) [row 0: freqs|freqs, row 1: 0|pi/2]
    # out_ref: (TB, dim) -- one full-width (lane-dense) store
    out_ref[...] = jnp.sin(
        x_ref[...] * t_ref[0:1, :] + t_ref[1:2, :]
    ).astype(out_ref.dtype)


def sinusoidal_pos_emb(x: jax.Array, dim: int, out_dtype=jnp.float32) -> jax.Array:
    """x: (B,) float timesteps -> (B, dim) embedding [sin | cos].

    Pass out_dtype=jnp.bfloat16 when the consumer accepts it (recommended on
    v5e, where the output writeback is the dominant HBM traffic).
    """
    assert dim % 2 == 0 and dim >= 4, "dim must be even and >= 4"
    b = x.shape[0]
    x = x.astype(jnp.float32)
    half = dim // 2
    freqs = _freq_table(dim)
    pattern = jnp.concatenate([freqs, freqs])               # (dim,)
    cparams = pltpu.CompilerParams(dimension_semantics=("parallel",))

    pack = _LANES // dim if (dim <= _LANES and _LANES % dim == 0) else 0
    use_packed = pack >= 1 and dim >= 16

    if use_packed:
        # Pad B up to a multiple of pack so the lane-dense path covers all
        # batch sizes; the pad rows are sliced off after the final reshape.
        b_pad = _round_up(b, pack)
        x_pad = jnp.pad(x, (0, b_pad - b)) if b_pad != b else x
        rows = b_pad // pack
        tr = _row_tile(rows)

        # x_cols[p, r, 0] = x[r*pack + p]
        x_cols = x_pad.reshape(rows, pack).T.reshape(pack, rows, 1)

        lane = jnp.arange(_LANES)
        w_freq = jnp.where(
            (lane[None, :] // dim) == jnp.arange(pack)[:, None],
            jnp.tile(pattern, pack)[None, :],
            0.0,
        )                                                    # (pack, 128)
        offset = jnp.where((lane % dim) < half, 0.0, _HALF_PI)[None, :]
        w = jnp.concatenate([w_freq, offset], axis=0).astype(jnp.float32)

        kernel = functools.partial(_packed_kernel, pack=pack)
        out_packed = pl.pallas_call(
            kernel,
            out_shape=jax.ShapeDtypeStruct((rows, _LANES), out_dtype),
            grid=(pl.cdiv(rows, tr),),
            in_specs=[
                pl.BlockSpec((pack, tr, 1), lambda i: (0, i, 0)),
                pl.BlockSpec((pack + 1, _LANES), lambda i: (0, 0)),
            ],
            out_specs=pl.BlockSpec((tr, _LANES), lambda i: (i, 0)),
            compiler_params=cparams,
        )(x_cols, w)
        # Contiguous reshape back to logical (B, dim); drop wrapper padding.
        return out_packed.reshape(b_pad, dim)[:b]

    # ------------------- fallback: row-wise, tiled over batch -------------
    tb = _row_tile(b)
    table = jnp.stack(
        [pattern, jnp.where(jnp.arange(dim) < half, 0.0, _HALF_PI)]
    ).astype(jnp.float32)                                    # (2, dim)
    return pl.pallas_call(
        _rowwise_kernel,
        out_shape=jax.ShapeDtypeStruct((b, dim), out_dtype),
        grid=(pl.cdiv(b, tb),),
        in_specs=[
            pl.BlockSpec((tb, 1), lambda i: (i, 0)),
            pl.BlockSpec((2, dim), lambda i: (0, 0)),
        ],
        out_specs=pl.BlockSpec((tb, dim), lambda i: (i, 0)),
        compiler_params=cparams,
    )(x.reshape(b, 1), table)


def _reference(x: jax.Array, dim: int) -> jax.Array:
    """Pure-JAX reference mirroring the PyTorch forward."""
    half = dim // 2
    emb = math.log(10000.0) / (half - 1)
    emb = jnp.exp(jnp.arange(half, dtype=jnp.float32) * -emb)
    emb = x.astype(jnp.float32)[:, None] * emb[None, :]
    return jnp.concatenate([jnp.sin(emb), jnp.cos(emb)], axis=-1)


if __name__ == "__main__":
    key = jax.random.PRNGKey(0)

    def _check(b, dim, subkey, out_dtype=jnp.float32, atol=1e-4):
        # atol=1e-4: cos(t) is computed as sin(t + pi/2); for t up to 1000
        # the f32 rounding of the add bounds |out - cos(t)| by ~3e-5.
        x = jax.random.uniform(subkey, (b,), dtype=jnp.float32,
                               minval=0.0, maxval=1000.0)
        out = jax.block_until_ready(sinusoidal_pos_emb(x, dim, out_dtype=out_dtype))
        ref = _reference(x, dim)
        assert out.shape == (b, dim), (out.shape, b, dim)
        assert out.dtype == out_dtype, out.dtype
        err = float(jnp.max(jnp.abs(out.astype(jnp.float32) - ref)))
        assert err <= atol, (b, dim, err)

    keys = jax.random.split(key, 5)
    _check(8, 32, keys[0])                 # packed lane-dense, pack=4
    _check(10, 32, keys[1])                # packed with wrapper-side batch padding
    _check(16, 64, keys[2])                # packed lane-dense, pack=2
    _check(24, 48, keys[3])                # fallback (48 ∤ 128), single full-width store
    _check(8, 128, keys[4], out_dtype=jnp.bfloat16, atol=2e-2)  # pack=1, bf16 output

    print("KERNEL_OK")
</pallas_src>

<mosaic_0001>
module attributes {stable_mosaic.version = 11 : i64} {
  func.func @_packed_kernel(%arg0: i32, %arg1: memref<4x2x1xf32, #tpu.memory_space<vmem>>, %arg2: memref<5x128xf32, #tpu.memory_space<vmem>>, %arg3: memref<2x128xf32, #tpu.memory_space<vmem>>) attributes {dimension_semantics = [#tpu.dimension_semantics<parallel>], iteration_bounds = array<i64: 1>, scalar_prefetch = 0 : i64, scratch_operands = 0 : i64, tpu.core_type = #tpu.core_type<tc>, window_params = [{transform_indices = @transform_0, window_bounds = array<i64: 4, 2, 1>}, {pipeline_mode = #tpu.pipeline_mode<synchronous>, transform_indices = @transform_1, window_bounds = array<i64: 5, 128>}, {transform_indices = @transform_2, window_bounds = array<i64: 2, 128>}]} {
    %c0 = arith.constant 0 : index
    %c0_0 = arith.constant 0 : index
    %c0_1 = arith.constant 0 : index
    %0 = vector.load %arg1[%c0, %c0_0, %c0_1] : memref<4x2x1xf32, #tpu.memory_space<vmem>>, vector<1x2x1xf32>
    %1 = vector.shape_cast %0 : vector<1x2x1xf32> to vector<2x1xf32>
    %c0_2 = arith.constant 0 : index
    %c0_3 = arith.constant 0 : index
    %2 = vector.load %arg2[%c0_2, %c0_3] : memref<5x128xf32, #tpu.memory_space<vmem>>, vector<1x128xf32>
    %3 = vector.broadcast %1 : vector<2x1xf32> to vector<2x128xf32>
    %4 = vector.broadcast %2 : vector<1x128xf32> to vector<2x128xf32>
    %5 = arith.mulf %3, %4 : vector<2x128xf32>
    %c4 = arith.constant 4 : index
    %c0_4 = arith.constant 0 : index
    %6 = vector.load %arg2[%c4, %c0_4] : memref<5x128xf32, #tpu.memory_space<vmem>>, vector<1x128xf32>
    %7 = vector.broadcast %6 : vector<1x128xf32> to vector<2x128xf32>
    %8 = arith.addf %5, %7 : vector<2x128xf32>
    %c1 = arith.constant 1 : index
    %c0_5 = arith.constant 0 : index
    %c0_6 = arith.constant 0 : index
    %9 = vector.load %arg1[%c1, %c0_5, %c0_6] : memref<4x2x1xf32, #tpu.memory_space<vmem>>, vector<1x2x1xf32>
    %10 = vector.shape_cast %9 : vector<1x2x1xf32> to vector<2x1xf32>
    %c1_7 = arith.constant 1 : index
    %c0_8 = arith.constant 0 : index
    %11 = vector.load %arg2[%c1_7, %c0_8] : memref<5x128xf32, #tpu.memory_space<vmem>>, vector<1x128xf32>
    %12 = vector.broadcast %10 : vector<2x1xf32> to vector<2x128xf32>
    %13 = vector.broadcast %11 : vector<1x128xf32> to vector<2x128xf32>
    %14 = arith.mulf %12, %13 : vector<2x128xf32>
    %15 = arith.addf %8, %14 : vector<2x128xf32>
    %c2 = arith.constant 2 : index
    %c0_9 = arith.constant 0 : index
    %c0_10 = arith.constant 0 : index
    %16 = vector.load %arg1[%c2, %c0_9, %c0_10] : memref<4x2x1xf32, #tpu.memory_space<vmem>>, vector<1x2x1xf32>
    %17 = vector.shape_cast %16 : vector<1x2x1xf32> to vector<2x1xf32>
    %c2_11 = arith.constant 2 : index
    %c0_12 = arith.constant 0 : index
    %18 = vector.load %arg2[%c2_11, %c0_12] : memref<5x128xf32, #tpu.memory_space<vmem>>, vector<1x128xf32>
    %19 = vector.broadcast %17 : vector<2x1xf32> to vector<2x128xf32>
    %20 = vector.broadcast %18 : vector<1x128xf32> to vector<2x128xf32>
    %21 = arith.mulf %19, %20 : vector<2x128xf32>
    %22 = arith.addf %15, %21 : vector<2x128xf32>
    %c3 = arith.constant 3 : index
    %c0_13 = arith.constant 0 : index
    %c0_14 = arith.constant 0 : index
    %23 = vector.load %arg1[%c3, %c0_13, %c0_14] : memref<4x2x1xf32, #tpu.memory_space<vmem>>, vector<1x2x1xf32>
    %24 = vector.shape_cast %23 : vector<1x2x1xf32> to vector<2x1xf32>
    %c3_15 = arith.constant 3 : index
    %c0_16 = arith.constant 0 : index
    %25 = vector.load %arg2[%c3_15, %c0_16] : memref<5x128xf32, #tpu.memory_space<vmem>>, vector<1x128xf32>
    %26 = vector.broadcast %24 : vector<2x1xf32> to vector<2x128xf32>
    %27 = vector.broadcast %25 : vector<1x128xf32> to vector<2x128xf32>
    %28 = arith.mulf %26, %27 : vector<2x128xf32>
    %29 = arith.addf %22, %28 : vector<2x128xf32>
    %30 = math.sin %29 : vector<2x128xf32>
    %c0_17 = arith.constant 0 : index
    %c0_18 = arith.constant 0 : index
    %31 = vector.load %arg3[%c0_17, %c0_18] : memref<2x128xf32, #tpu.memory_space<vmem>>, vector<2x128xf32>
    tpu.vector_store %arg3[%c0_17, %c0_18], %30 {strides = array<i32>} : memref<2x128xf32, #tpu.memory_space<vmem>>, vector<2x128xf32>,
    return
  }
  func.func @transform_0(%arg0: i32) -> (i32, i32, i32) {
    %c0_i32 = arith.constant 0 : i32
    %c0_i32_0 = arith.constant 0 : i32
    %c0_i32_1 = arith.constant 0 : i32
    return %c0_i32, %arg0, %c0_i32_0 : i32, i32, i32
  }
  func.func @transform_1(%arg0: i32) -> (i32, i32) {
    %c0_i32 = arith.constant 0 : i32
    %c0_i32_0 = arith.constant 0 : i32
    %c0_i32_1 = arith.constant 0 : i32
    return %c0_i32, %c0_i32_0 : i32, i32
  }
  func.func @transform_2(%arg0: i32) -> (i32, i32) {
    %c0_i32 = arith.constant 0 : i32
    %c0_i32_0 = arith.constant 0 : i32
    return %arg0, %c0_i32 : i32, i32
  }
}

</mosaic_0001>

<bundles_post_ra>
// kernel: tpu_custom_call.1
= control target key start
LH: loop header
LB: loop body
LE: loop exit
PB: predicated region body
PF: predicated region fallthrough
CT: control target
= control target key end

     0   :  { %v243_v2 = vmov 0   ;;  %s317_s0 = inlined_call_operand.vmem [shape: f32[4,2,1], index: 0, kind: input, shape index: {}]   ;;  %s318_s1 = inlined_call_operand.vmem [shape: f32[5,128], index: 1, kind: input, shape index: {}]   ;;  %s319_s2 = inlined_call_operand.hbm [shape: f32[2,128], index: 2, kind: output, shape index: {}]  }
   0x1   :  { %v195_v0 = vld [vmem:[%s317_s0 + $0x4] sm:$0x3]  ;;  %v12_v1 = vld [vmem:[%s317_s0] sm:$0x3]  ;;  %216 = vset.pattern.permute.xlu1 %v243_v2  ;;  %215 = vset.pattern.permute.xlu0 %v243_v2  ;;  %v197_v3 = vld [vmem:[%s317_s0 + $0x6] sm:$0x3] }
   0x2   :  { %49 = vperm.xlu1 %216, %v195_v0   ;;  %16 = vperm.xlu0 %215, %v12_v1   ;;  %v193_v4 = vld [vmem:[%s317_s0 + $0x2] sm:$0x3] }
   0x3   :  { %7 = vsyncpa [#allocation3], 0  ;;  %v191_v5 = vld [vmem:[%s318_s1] ss:$0 sm:$0xff]  ;;  %v192_v9 = vld [vmem:[%s318_s1 + $0x4] ss:$0 sm:$0xff] }
   0x4   :  { %v194_v10 = vld [vmem:[%s318_s1 + $0x1] ss:$0 sm:$0xff]  ;;  %v196_v11 = vld [vmem:[%s318_s1 + $0x2] ss:$0 sm:$0xff]  ;;  %v198_v15 = vld [vmem:[%s318_s1 + $0x3] ss:$0 sm:$0xff] }
   0x5   :  { %v244_v32 = vmov 683565275   ;;  %v245_v34 = vmov 2475754826   ;;  %v246_v37 = vmov 2131351028  }
   0x6   :  { %63 = vperm.xlu1 %216, %v197_v3   ;;  %35 = vperm.xlu0 %215, %v193_v4   ;;  %v247_v40 = vmov 2102212464   ;;  %v248_v43 = vmov 920167782   ;;  %v249_v46 = vmov 1326507024  }
   0x7   :  { %s250_s1 = smov [#allocation2]  }
   0x8   :  { %s183_s26 = sshll.u32 %s250_s1, 4  ;;  %s184_s26 = int_to_ptr.vmem [resolvable:$true] %s183_s26 }
   0x9   :  { %s221_s27 = scalar_lea.vmem %s184_s26, 32  ;;  %p226_p1 = scmp.lt.s32.totalorder %s184_s26, %s184_s26 }
   0xa   :  { %p222_p0 = scmp.ne.s32.totalorder %s184_s26, %s221_s27  ;;  %p227_p2 = scmp.lt.s32.totalorder %s221_s27, %s221_s27 }
   0xc   :  { %p228_p3 = por %p227_p2, %p226_p1 }
   0xe   :  { %p229_p4 = pnand %p228_p3, %p222_p0 }
  0x7d   :  { %v50_v6 = vpop.permute.xlu1 %49  ;;  %v17_v7 = vpop.permute.xlu0 %16 }
  0x7e   :  { %v23_v8 = vmul.f32 %v191_v5, %v17_v7  ;;  %v56_v17 = vmul.f32 %v196_v11, %v50_v6 }
  0x80   :  { %v29_v13 = vadd.f32 %v192_v9, %v23_v8 }
  0x81   :  { %v36_v12 = vpop.permute.xlu0 %35  ;;  %v64_v16 = vpop.permute.xlu1 %63 }
  0x82   :  { %v42_v14 = vmul.f32 %v194_v10, %v36_v12  ;;  %v70_v19 = vmul.f32 %v198_v15, %v64_v16 }
  0x84   :  { %v43_v18 = vadd.f32 %v42_v14, %v29_v13 }
  0x86   :  { %v57_v20 = vadd.f32 %v56_v17, %v43_v18 }
  0x88   :  { %v293_v21 = vadd.f32 %v70_v19, %v57_v20 }
  0x8a   :  { %v75_v22 = vand.u32 2139095040, %v293_v21  ;;  %v72_v26 = vand.u32 2147483647, %v293_v21  ;;  %vm74_vm7 = vcmp.lt.s32.totalorder %v293_v21, 0  ;;  %vm164_vm12 = vweird.f32 %v293_v21 }
  0x8c   :  { %v76_v23 = vshrl.u32 %v75_v22, 23  ;;  %v79_v30 = vand.u32 8388607, %v72_v26  ;;  %vm73_vm8 = vcmp.le.f32.partialorder %v72_v26, 0.7853982 }
  0x8e   :  { %v199_v24 = vadd.s32 4294967169, %v76_v23  ;;  %v80_v48 = vor.u32 8388608, %v79_v30 }
  0x90   :  { %v82_v25 = vadd.s32 1, %v199_v24  ;;  %v120_v62 = vshll.u32 %v80_v48, 8 }
  0x92   :  { %vm83_vm0 = vcmp.gt.s32.totalorder %v82_v25, 0 }
  0x93   :  { %v84_v27 = vsel %vm83_vm0, %v82_v25, 0 }
  0x94   :  { %v86_v28 = vand.u32 31, %v84_v27  ;;  %v85_v31 = vshrl.u32 %v84_v27, 5 }
  0x96   :  { %v87_v29 = vsub.s32 32, %v86_v28  ;;  %v89_v33 = vshll.u32 %v244_v32, %v86_v28  ;;  %v92_v35 = vshll.u32 %v245_v34, %v86_v28  ;;  %v95_v39 = vshll.u32 %v246_v37, %v86_v28 }
  0x97   :  { %v98_v42 = vshll.u32 %v247_v40, %v86_v28  ;;  %v101_v45 = vshll.u32 %v248_v43, %v86_v28  ;;  %vm104_vm1 = vcmp.lt.s32.totalorder %v85_v31, 1  ;;  %vm107_vm2 = vcmp.lt.s32.totalorder %v85_v31, 4 }
  0x98   :  { %v90_v36 = vshrl.u32 %v245_v34, %v87_v29  ;;  %v93_v38 = vshrl.u32 %v246_v37, %v87_v29  ;;  %v96_v41 = vshrl.u32 %v247_v40, %v87_v29  ;;  %v99_v44 = vshrl.u32 %v248_v43, %v87_v29 }
  0x99   :  { %v102_v47 = vshrl.u32 %v249_v46, %v87_v29  ;;  %v88_v57 = vshrl.u32 %v244_v32, %v87_v29  ;;  %vm106_vm3 = vcmp.lt.s32.totalorder %v85_v31, 3  ;;  %vm105_vm4 = vcmp.lt.s32.totalorder %v85_v31, 2 }
  0x9a   :  { %v91_v49 = vor.u32 %v90_v36, %v89_v33  ;;  %v94_v50 = vor.u32 %v93_v38, %v92_v35  ;;  %v97_v51 = vor.u32 %v96_v41, %v95_v39  ;;  %v100_v52 = vor.u32 %v99_v44, %v98_v42 }
  0x9b   :  { %v103_v53 = vor.u32 %v102_v47, %v101_v45 }
  0x9c   :  { %v109_v54 = vsel %vm107_vm2, %v97_v51, 2102212464  ;;  %v112_v55 = vsel %vm104_vm1, %v91_v49, %v94_v50  ;;  %v116_v56 = vsel %vm104_vm1, %v94_v50, %v97_v51  ;;  %v113_v58 = vsel %vm107_vm2, %v100_v52, 920167782 }
  0x9d   :  { %v117_v59 = vsel %vm107_vm2, %v103_v53, 1326507024  ;;  %v114_v60 = vsel %vm106_vm3, %v97_v51, %v113_v58  ;;  %v108_v63 = vsel %vm104_vm1, %v88_v57, %v91_v49  ;;  %v110_v0 = vsel %vm106_vm3, %v94_v50, %v109_v54 }
  0x9e   :  { %v118_v61 = vsel %vm106_vm3, %v100_v52, %v117_v59  ;;  %v115_v1 = vsel %vm105_vm4, %v112_v55, %v114_v60  ;;  %v111_v7 = vsel %vm105_vm4, %v108_v63, %v110_v0 }
  0x9f   :  { %v119_v2 = vsel %vm105_vm4, %v116_v56, %v118_v61  ;;  %v302_v5 = vmul.u32.u64.low %v120_v62, %v115_v1  ;;  %v303_v6 = vmul.u32.u64.high %v120_v62, %v115_v1, %v302_v5  ;;  %v127_v9 = vmul.u32 %v120_v62, %v111_v7 }
  0xa0   :  { %v299_v3 = vmul.u32.u64.low %v120_v62, %v119_v2  ;;  %v300_v4 = vmul.u32.u64.high %v120_v62, %v119_v2, %v299_v3 }
  0xa1   :  { %v130_v8 = vadd.s32 1, %v303_v6 }
  0xa2   :  { %vm129_vm5 = vc.u32 %v300_v4, %v302_v5  ;;  %v128_v22 = vadd.s32 %v302_v5, %v300_v4 }
  0xa3   :  { %v131_v10 = vsel %vm129_vm5, %v130_v8, %v303_v6 }
  0xa4   :  { %v132_v11 = vadd.s32 %v131_v10, %v127_v9 }
  0xa6   :  { %v133_v12 = vadd.s32 536870912, %v132_v11 }
  0xa8   :  { %v134_v13 = vshrl.u32 %v133_v12, 30 }
  0xaa   :  { %v135_v14 = vshll.u32 %v134_v13, 30  ;;  %v158_v36 = vsub.s32 4, %v134_v13 }
  0xac   :  { %v136_v15 = vsub.s32 %v132_v11, %v135_v14  ;;  %v159_v39 = vsel %vm74_vm7, %v158_v36, %v134_v13 }
  0xad   :  { %v161_v40 = vsel %vm73_vm8, 0, %v159_v39 }
  0xae   :  { %v138_v16 = vsub.s32 0, %v136_v15  ;;  %v165_v41 = vadd.s32 3, %v161_v40 }
  0xb0   :  { %v200_v17 = vmin.u32 %v138_v16, %v136_v15  ;;  %v166_v42 = vand.u32 3, %v165_v41 }
  0xb2   :  { %v140_v18 = vclz %v200_v17  ;;  %vm171_vm9 = vcmp.eq.s32.totalorder %v166_v42, 2  ;;  %vm168_vm10 = vcmp.eq.s32.totalorder %v166_v42, 0  ;;  %vm167_vm11 = vcmp.lt.s32.totalorder %v166_v42, 2 }
  0xb4   :  { %v201_v19 = vadd.s32 4294967294, %v140_v18 }
  0xb6   :  { %vm202_vm6 = vcmp.lt.s32.totalorder %v201_v19, 0 }
  0xb7   :  { %v143_v20 = vsel %vm202_vm6, 0, %v201_v19 }
  0xb8   :  { %v144_v23 = vsub.s32 32, %v143_v20  ;;  %v148_v24 = vsub.s32 4294967266, %v143_v20  ;;  %v145_v25 = vshll.u32 %v136_v15, %v143_v20 }
  0xba   :  { %v146_v27 = vshrl.u32 %v128_v22, %v144_v23  ;;  %v149_v28 = vadd.s32 127, %v148_v24 }
  0xbc   :  { %v147_v29 = vor.u32 %v146_v27, %v145_v25  ;;  %v150_v30 = vshll.u32 %v149_v28, 23 }
  0xbe   :  { %v151_v31 = vor.u32 4788187, %v150_v30  ;;  %v154_v33 = vcvt.s32.f32 %v147_v29 }
  0xc0   :  { %v152_v32 = vand.u32 2147483647, %v151_v31 }
  0xc2   :  { %v155_v34 = vmul.f32 %v154_v33, %v152_v32 }
  0xc4   :  { %v156_v35 = vxor.u32 2147483648, %v155_v34 }
  0xc6   :  { %v157_v37 = vsel %vm74_vm7, %v156_v35, %v155_v34 }
  0xc7   :  { %v160_v38 = vsel %vm73_vm8, %v293_v21, %v157_v37 }
  0xc8   :  { %217 = vcosq.f32 %v160_v38 }
  0xc9   :  { %219 = vsinq.f32 %v160_v38 }
  0xd5   :  { %v218_v43 = vpop.eup %217 }
  0xd6   :  { %v220_v44 = vpop.eup %219  ;;  %v172_v45 = vxor.u32 2147483648, %v218_v43 }
  0xd7   :  { %v169_v46 = vxor.u32 2147483648, %v220_v44 }
  0xd8   :  { %v173_v47 = vsel %vm171_vm9, %v172_v45, %v220_v44 }
  0xd9   :  { %v170_v26 = vsel %vm168_vm10, %v218_v43, %v169_v46 }
  0xda   :  { %v174_v48 = vsel %vm167_vm11, %v170_v26, %v173_v47 }
  0xdb   :  { %v175_v49 = vsel %vm164_vm12, nan, %v174_v48 }
  0xdc   :  { %176 = vst [vmem:[#allocation2] sm:$0x3] %v175_v49 }
  0xdd   :  { %232 = shalt.err (!%p229_p4)
}
  0xde   :  { %186 = dma.vmem_to_hbm [thread:$0]  %s184_s26, 32, %s319_s2, [#allocation3]  }
  0xdf   :  { %241 = dma.done.wait [#allocation3], 32  }
  0xe0   :  { %242 = vsyncadd [#allocation3], 4294967264 }
  0xe1   :  { %190 = vsyncpa [#allocation3], 1 }

</bundles_post_ra>
